<compile_context>
chip_gen: v7x
topology: tpu7x:2x2x1
jax: 0.10.0
libtpu: 0.0.40
codegen_flags: <defaults>
</compile_context>

<pallas_src>
import jax
import jax.numpy as jnp
import numpy as np
from jax.experimental import pallas as pl
from jax.experimental.pallas import tpu as pltpu


def _round_up(x, m):
    return ((x + m - 1) // m) * m


# ---------------------------------------------------------------------------
# Shared in-kernel math
# ---------------------------------------------------------------------------
def _gates_to_outputs(pre, c_prev, H):
    """pre: (M, 5H) pre-activations, columns ordered [i, f, o, sen, g]."""
    sig = jax.nn.sigmoid(pre[:, :4 * H])          # one wide sigmoid slab
    g_g = jnp.tanh(pre[:, 4 * H:5 * H])           # one tanh slab
    # NOTE: 32-lane gate slices cost a few XLU rotates at H=32; fine here.
    i_g = sig[:, 0 * H:1 * H]
    f_g = sig[:, 1 * H:2 * H]
    o_g = sig[:, 2 * H:3 * H]
    s_g = sig[:, 3 * H:4 * H]
    ct = f_g * c_prev + i_g * g_g
    tanh_ct = jnp.tanh(ct)                        # computed once, reused
    return o_g * tanh_ct, ct, s_g * tanh_ct


def _pack_out(ht, ct, st, out_w):
    """Assemble one lane-dense (M, out_w) slab [ht | ct | st | 0...]."""
    H = ht.shape[1]
    blocks = [ht, ct, st]
    pad = out_w - 3 * H
    if pad:
        blocks.append(jnp.zeros((ht.shape[0], pad), ht.dtype))
    return jnp.concatenate(blocks, axis=1)


# ---------------------------------------------------------------------------
# Single-step kernel (matches the PyTorch module's forward contract)
# ---------------------------------------------------------------------------
def _cell_kernel(xh_ref, w_ref, c_ref, out_ref):
    """xh_ref: (tb, Kp) = [x | h | 1 | 0-pad]; w_ref: (Kp, 5H) fused weights
    with the bias row folded in; c_ref: (tb, H); out_ref: (tb, out_w)."""
    H = c_ref.shape[1]
    pre = jnp.dot(xh_ref[...], w_ref[...],
                  preferred_element_type=jnp.float32)          # one MXU call
    ht, ct, st = _gates_to_outputs(pre, c_ref[...], H)
    out_ref[...] = _pack_out(ht, ct, st, out_ref.shape[1]).astype(out_ref.dtype)


# ---------------------------------------------------------------------------
# Recurrent kernel: grid=(T,), h/c carried in VMEM scratch, W_h resident
# ---------------------------------------------------------------------------
def _seq_kernel(xp_ref, wh_ref, h0_ref, c0_ref, out_ref, h_sc, c_sc):
    """xp_ref: (B, 5H) per-step x-projection (bias already folded in);
    wh_ref: (H, 5H) VMEM-resident; out_ref: (B, out_w) per-step slab."""
    H = c0_ref.shape[1]

    @pl.when(pl.program_id(0) == 0)
    def _():
        h_sc[...] = h0_ref[...].astype(jnp.float32)
        c_sc[...] = c0_ref[...].astype(jnp.float32)

    pre = xp_ref[...] + jnp.dot(h_sc[...], wh_ref[...],
                                preferred_element_type=jnp.float32)
    ht, ct, st = _gates_to_outputs(pre, c_sc[...], H)
    h_sc[...] = ht
    c_sc[...] = ct
    out_ref[...] = _pack_out(ht, ct, st, out_ref.shape[1]).astype(out_ref.dtype)


# ---------------------------------------------------------------------------
# Parameter fusion (hoisted: run ONCE at parameter-load time)
# ---------------------------------------------------------------------------
def fuse_adaptive_lstm_params(params):
    w_ih_t = params["w_ih"].T            # (D, 4H), cols [i, f, g, o]
    w_hh_t = params["w_hh"].T            # (H, 4H)
    w_xg_t = params["w_xg"].T            # (D, H)
    w_hg_t = params["w_hg"].T            # (H, H)
    D = w_ih_t.shape[0]
    H = w_hg_t.shape[0]

    def reorder(w4, wsen):
        # columns [i, f, g, o] + sentinel  ->  [i, f, o, sen, g]
        return jnp.concatenate(
            [w4[:, 0 * H:1 * H], w4[:, 1 * H:2 * H], w4[:, 3 * H:4 * H],
             wsen, w4[:, 2 * H:3 * H]], axis=1)

    w_x = reorder(w_ih_t, w_xg_t)        # (D, 5H)
    w_h = reorder(w_hh_t, w_hg_t)        # (H, 5H)

    b_lstm = params["b_ih"] + params["b_hh"]            # (4H,) [i,f,g,o]
    b_sen = params["b_xg"] + params["b_hg"]             # (H,)
    b_fused = jnp.concatenate(
        [b_lstm[0 * H:1 * H], b_lstm[1 * H:2 * H], b_lstm[3 * H:4 * H],
         b_sen, b_lstm[2 * H:3 * H]]).astype(jnp.float32)          # (5H,)

    # Single-step augmented weight: bias folded as an extra row (the input
    # gets a ones column); K padded to a multiple of 8 with zero rows.
    k_raw = D + H + 1
    k_pad = (-k_raw) % 8
    w_aug = jnp.concatenate(
        [w_x, w_h, b_fused[None, :],
         jnp.zeros((k_pad, 5 * H), jnp.float32)], axis=0)          # (Kp, 5H)

    return {"D": D, "H": H, "Kp": k_raw + k_pad,
            "w_x": w_x, "w_h": w_h, "b": b_fused, "w_aug": w_aug}


# ---------------------------------------------------------------------------
# Wrappers
# ---------------------------------------------------------------------------
def adaptive_lstm_cell(x, h_old, c_old, fused):
    """One cell step (same contract as AdaptiveLSTMCell.forward)."""
    B = x.shape[0]
    D, H, Kp = fused["D"], fused["H"], fused["Kp"]
    out_w = _round_up(3 * H, 128)                     # lane-dense output slab

    pad_cols = Kp - (D + H + 1)
    xh = jnp.concatenate(
        [x.astype(jnp.float32), h_old.astype(jnp.float32),
         jnp.ones((B, 1), jnp.float32),
         jnp.zeros((B, pad_cols), jnp.float32)], axis=1)           # (B, Kp)

    # Batch-tile grid axis: "parallel" so large batches shard across cores
    # (v7x megacore); for small B this is a single tile.
    tb = 128 if (B > 128 and B % 128 == 0) else B
    grid = (B // tb,)

    ce = pl.CostEstimate(
        flops=2 * B * Kp * 5 * H + 8 * B * H,
        transcendentals=6 * B * H,
        bytes_accessed=4 * (B * Kp + Kp * 5 * H + B * H + B * out_w))

    out = pl.pallas_call(
        _cell_kernel,
        out_shape=jax.ShapeDtypeStruct((B, out_w), jnp.float32),
        grid=grid,
        in_specs=[
            pl.BlockSpec((tb, Kp), lambda b: (b, 0)),        # [x|h|1|0] tile
            pl.BlockSpec((Kp, 5 * H), lambda b: (0, 0)),     # fused W (resident)
            pl.BlockSpec((tb, H), lambda b: (b, 0)),         # c_old tile
        ],
        out_specs=pl.BlockSpec((tb, out_w), lambda b: (b, 0)),
        compiler_params=pltpu.CompilerParams(
            dimension_semantics=("parallel",)),
        cost_estimate=ce,
    )(xh, fused["w_aug"], c_old)

    return out[:, 0:H], out[:, H:2 * H], out[:, 2 * H:3 * H]


def adaptive_lstm_sequence(x_seq, h0, c0, fused):
    """Apply the cell over T steps inside ONE kernel (recurrent variant)."""
    T, B, D = x_seq.shape
    H = fused["H"]
    out_w = _round_up(3 * H, 128)

    # Precompute the x-projection for ALL steps with one large matmul outside
    # the kernel; bias folded in. Only h @ W_h remains inside the per-step loop.
    xp = (x_seq.reshape(T * B, D).astype(jnp.float32) @ fused["w_x"]
          + fused["b"][None, :]).astype(jnp.float32)               # (T*B, 5H)

    ce = pl.CostEstimate(
        flops=T * (2 * B * H * 5 * H + 8 * B * H),
        transcendentals=T * 6 * B * H,
        bytes_accessed=4 * (T * B * 5 * H + H * 5 * H + 2 * B * H
                            + T * B * out_w))

    out = pl.pallas_call(
        _seq_kernel,
        out_shape=jax.ShapeDtypeStruct((T * B, out_w), jnp.float32),
        grid=(T,),
        in_specs=[
            pl.BlockSpec((B, 5 * H), lambda t: (t, 0)),      # per-step x-proj
            pl.BlockSpec((H, 5 * H), lambda t: (0, 0)),      # W_h (VMEM-resident)
            pl.BlockSpec((B, H), lambda t: (0, 0)),          # h0 (resident)
            pl.BlockSpec((B, H), lambda t: (0, 0)),          # c0 (resident)
        ],
        out_specs=pl.BlockSpec((B, out_w), lambda t: (t, 0)),
        scratch_shapes=[
            pltpu.VMEM((B, H), jnp.float32),                 # h carry
            pltpu.VMEM((B, H), jnp.float32),                 # c carry
        ],
        compiler_params=pltpu.CompilerParams(
            dimension_semantics=("arbitrary",)),             # true recurrence
        cost_estimate=ce,
    )(xp, fused["w_h"], h0, c0)

    out = out.reshape(T, B, out_w)
    return out[:, :, 0:H], out[:, :, H:2 * H], out[:, :, 2 * H:3 * H]


# ---------------------------------------------------------------------------
# Pure-JAX references (mirror torch.nn.LSTMCell + sentinel gates)
# ---------------------------------------------------------------------------
def reference_forward(x, h_old, c_old, p):
    gates = x @ p["w_ih"].T + p["b_ih"] + h_old @ p["w_hh"].T + p["b_hh"]
    H = h_old.shape[1]
    i = jax.nn.sigmoid(gates[:, 0 * H:1 * H])
    f = jax.nn.sigmoid(gates[:, 1 * H:2 * H])
    g = jnp.tanh(gates[:, 2 * H:3 * H])
    o = jax.nn.sigmoid(gates[:, 3 * H:4 * H])
    ct = f * c_old + i * g
    ht = o * jnp.tanh(ct)
    sen = jax.nn.sigmoid(x @ p["w_xg"].T + p["b_xg"]
                         + h_old @ p["w_hg"].T + p["b_hg"])
    return ht, ct, sen * jnp.tanh(ct)


def reference_sequence(x_seq, h0, c0, p):
    def step(carry, x_t):
        h, c = carry
        ht, ct, st = reference_forward(x_t, h, c, p)
        return (ht, ct), (ht, ct, st)
    _, (hs, cs, ss) = jax.lax.scan(step, (h0, c0), x_seq)
    return hs, cs, ss


def init_params(key, input_size, hidden_size):
    ks = jax.random.split(key, 8)
    bound = 1.0 / np.sqrt(hidden_size)
    u = lambda k, shape: jax.random.uniform(
        k, shape, jnp.float32, minval=-bound, maxval=bound)
    return {
        "w_ih": u(ks[0], (4 * hidden_size, input_size)),
        "w_hh": u(ks[1], (4 * hidden_size, hidden_size)),
        "b_ih": u(ks[2], (4 * hidden_size,)),
        "b_hh": u(ks[3], (4 * hidden_size,)),
        "w_xg": u(ks[4], (hidden_size, input_size)),
        "b_xg": u(ks[5], (hidden_size,)),
        "w_hg": u(ks[6], (hidden_size, hidden_size)),
        "b_hg": u(ks[7], (hidden_size,)),
    }


if __name__ == "__main__":
    B, D, H, T = 8, 16, 32, 12  # batch, input_size, hidden_size, seq_len

    key = jax.random.PRNGKey(0)
    kp, kx, kh, kc, ks = jax.random.split(key, 5)
    params = init_params(kp, D, H)
    fused = fuse_adaptive_lstm_params(params)       # hoisted: done once

    x = jax.random.normal(kx, (B, D), jnp.float32)
    h_old = jax.random.normal(kh, (B, H), jnp.float32)
    c_old = jax.random.normal(kc, (B, H), jnp.float32)
    x_seq = jax.random.normal(ks, (T, B, D), jnp.float32)

    # --- single cell step (the PyTorch module's forward) -------------------
    ht, ct, st = adaptive_lstm_cell(x, h_old, c_old, fused)
    jax.block_until_ready((ht, ct, st))
    ht_r, ct_r, st_r = reference_forward(x, h_old, c_old, params)
    assert np.allclose(np.asarray(ht), np.asarray(ht_r), atol=1e-5, rtol=1e-5)
    assert np.allclose(np.asarray(ct), np.asarray(ct_r), atol=1e-5, rtol=1e-5)
    assert np.allclose(np.asarray(st), np.asarray(st_r), atol=1e-5, rtol=1e-5)

    # --- recurrent variant: T steps fused into one kernel ------------------
    hs, cs, ss = adaptive_lstm_sequence(x_seq, h_old, c_old, fused)
    jax.block_until_ready((hs, cs, ss))
    hs_r, cs_r, ss_r = reference_sequence(x_seq, h_old, c_old, params)
    assert np.allclose(np.asarray(hs), np.asarray(hs_r), atol=1e-4, rtol=1e-4)
    assert np.allclose(np.asarray(cs), np.asarray(cs_r), atol=1e-4, rtol=1e-4)
    assert np.allclose(np.asarray(ss), np.asarray(ss_r), atol=1e-4, rtol=1e-4)

    print("KERNEL_OK")
</pallas_src>

<mosaic_0001>
module attributes {stable_mosaic.version = 11 : i64} {
  func.func @_cell_kernel(%arg0: i32, %arg1: memref<8x56xf32, #tpu.memory_space<vmem>>, %arg2: memref<56x160xf32, #tpu.memory_space<vmem>>, %arg3: memref<8x32xf32, #tpu.memory_space<vmem>>, %arg4: memref<8x128xf32, #tpu.memory_space<vmem>>) attributes {dimension_semantics = [#tpu.dimension_semantics<parallel>], iteration_bounds = array<i64: 1>, scalar_prefetch = 0 : i64, scratch_operands = 0 : i64, tpu.core_type = #tpu.core_type<tc>, window_params = [{transform_indices = @transform_0, window_bounds = array<i64: 8, 56>}, {pipeline_mode = #tpu.pipeline_mode<synchronous>, transform_indices = @transform_1, window_bounds = array<i64: 56, 160>}, {transform_indices = @transform_2, window_bounds = array<i64: 8, 32>}, {transform_indices = @transform_3, window_bounds = array<i64: 8, 128>}]} {
    %c0 = arith.constant 0 : index
    %c0_0 = arith.constant 0 : index
    %0 = vector.load %arg1[%c0, %c0_0] : memref<8x56xf32, #tpu.memory_space<vmem>>, vector<8x56xf32>
    %c0_1 = arith.constant 0 : index
    %c0_2 = arith.constant 0 : index
    %1 = vector.load %arg2[%c0_1, %c0_2] : memref<56x160xf32, #tpu.memory_space<vmem>>, vector<56x160xf32>
    %cst = arith.constant dense<0.000000e+00> : vector<8x160xf32>
    %2 = tpu.matmul %0, %1, %cst {dimension_numbers = #tpu.dot_dimension_numbers<[1], [0], [0], [1], [0, 0, 1, 1], [], []>} : vector<8x56xf32>, vector<56x160xf32>, vector<8x160xf32> -> vector<8x160xf32>
    %c0_3 = arith.constant 0 : index
    %c0_4 = arith.constant 0 : index
    %3 = vector.load %arg3[%c0_3, %c0_4] : memref<8x32xf32, #tpu.memory_space<vmem>>, vector<8x32xf32>
    %4 = vector.extract_strided_slice %2 {offsets = [0, 0], sizes = [8, 128], strides = [1, 1]} : vector<8x160xf32> to vector<8x128xf32>
    %5 = arith.negf %4 : vector<8x128xf32>
    %6 = math.exp %5 : vector<8x128xf32>
    %cst_5 = arith.constant 1.000000e+00 : f32
    %7 = vector.broadcast %cst_5 : f32 to vector<8x128xf32>
    %8 = arith.addf %7, %6 : vector<8x128xf32>
    %9 = arith.divf %7, %8 : vector<8x128xf32>
    %10 = vector.extract_strided_slice %2 {offsets = [0, 128], sizes = [8, 32], strides = [1, 1]} : vector<8x160xf32> to vector<8x32xf32>
    %11 = math.tanh %10 : vector<8x32xf32>
    %12 = vector.extract_strided_slice %9 {offsets = [0, 0], sizes = [8, 32], strides = [1, 1]} : vector<8x128xf32> to vector<8x32xf32>
    %13 = vector.extract_strided_slice %9 {offsets = [0, 32], sizes = [8, 32], strides = [1, 1]} : vector<8x128xf32> to vector<8x32xf32>
    %14 = vector.extract_strided_slice %9 {offsets = [0, 64], sizes = [8, 32], strides = [1, 1]} : vector<8x128xf32> to vector<8x32xf32>
    %15 = vector.extract_strided_slice %9 {offsets = [0, 96], sizes = [8, 32], strides = [1, 1]} : vector<8x128xf32> to vector<8x32xf32>
    %16 = arith.mulf %13, %3 : vector<8x32xf32>
    %17 = arith.mulf %12, %11 : vector<8x32xf32>
    %18 = arith.addf %16, %17 : vector<8x32xf32>
    %19 = math.tanh %18 : vector<8x32xf32>
    %20 = arith.mulf %14, %19 : vector<8x32xf32>
    %21 = arith.mulf %15, %19 : vector<8x32xf32>
    %cst_6 = arith.constant 0.000000e+00 : f32
    %22 = vector.broadcast %cst_6 : f32 to vector<8x32xf32>
    %23 = tpu.concatenate %20, %18, %21, %22 in 1 : vector<8x32xf32>, vector<8x32xf32>, vector<8x32xf32>, vector<8x32xf32> -> vector<8x128xf32>
    %c0_7 = arith.constant 0 : index
    %c0_8 = arith.constant 0 : index
    %24 = vector.load %arg4[%c0_7, %c0_8] : memref<8x128xf32, #tpu.memory_space<vmem>>, vector<8x128xf32>
    tpu.vector_store %arg4[%c0_7, %c0_8], %23 {strides = array<i32>} : memref<8x128xf32, #tpu.memory_space<vmem>>, vector<8x128xf32>,
    return
  }
  func.func @transform_0(%arg0: i32) -> (i32, i32) {
    %c0_i32 = arith.constant 0 : i32
    %c0_i32_0 = arith.constant 0 : i32
    return %arg0, %c0_i32 : i32, i32
  }
  func.func @transform_1(%arg0: i32) -> (i32, i32) {
    %c0_i32 = arith.constant 0 : i32
    %c0_i32_0 = arith.constant 0 : i32
    %c0_i32_1 = arith.constant 0 : i32
    return %c0_i32, %c0_i32_0 : i32, i32
  }
  func.func @transform_2(%arg0: i32) -> (i32, i32) {
    %c0_i32 = arith.constant 0 : i32
    %c0_i32_0 = arith.constant 0 : i32
    return %arg0, %c0_i32 : i32, i32
  }
  func.func @transform_3(%arg0: i32) -> (i32, i32) {
    %c0_i32 = arith.constant 0 : i32
    %c0_i32_0 = arith.constant 0 : i32
    return %arg0, %c0_i32 : i32, i32
  }
}

</mosaic_0001>

<bundles_post_ra>
// kernel: tpu_custom_call.1
= control target key start
LH: loop header
LB: loop body
LE: loop exit
PB: predicated region body
PF: predicated region fallthrough
CT: control target
= control target key end

     0   :  { %8 = vsyncpa [#allocation3], 0  ;;  %s409_s0 = inlined_call_operand.hbm [shape: f32[8,56], index: 0, kind: input, shape index: {}]   ;;  %s410_s1 = inlined_call_operand.hbm [shape: f32[56,160], index: 1, kind: input, shape index: {}]   ;;  %s411_s2 = inlined_call_operand.hbm [shape: f32[8,32], index: 2, kind: input, shape index: {}]   ;;  %s412_s3 = inlined_call_operand.hbm [shape: f32[8,128], index: 3, kind: output, shape index: {}]  }
   0x1   :  { %9 = vsyncpa [#allocation6], 0 }
   0x2   :  { %10 = vsyncpa [#allocation4], 0  ;;  %s328_s12 = smov [#allocation5]   ;;  %s234_s16 = scalar_lea.hbm %s410_s1, 1792 }
   0x3   :  { %s26_s13 = sshll.u32 %s328_s12, 4  ;;  %p235_p0 = scmp.ne.s32.totalorder %s410_s1, %s234_s16  ;;  %s27_s13 = int_to_ptr.vmem [resolvable:$true] %s26_s13 }
   0x4   :  { %p238_p1 = scmp.lt.u32.totalorder %s234_s16, %s410_s1 }
   0x6   :  { %p240_p2 = pnand %p238_p1, %p235_p0 }
   0x8   :  { %243 = shalt.err (!%p240_p2)
}
   0x9   :  { %s244_s21 = scalar_lea.vmem %s27_s13, 1792  ;;  %p249_p4 = scmp.lt.s32.totalorder %s27_s13, %s27_s13 }
   0xa   :  { %p245_p3 = scmp.ne.s32.totalorder %s27_s13, %s244_s21  ;;  %p250_p5 = scmp.lt.s32.totalorder %s244_s21, %s244_s21 }
   0xc   :  { %p251_p6 = por %p250_p5, %p249_p4 }
   0xe   :  { %p252_p7 = pnand %p251_p6, %p245_p3 }
  0x10   :  { %255 = shalt.err (!%p252_p7)
}
  0x11   :  { %s329_s22 = smov 256   ;;  %s330_s23 = smov 16  }
  0x12   :  { %32 = dma.hbm_to_vmem [thread:$0]  %s410_s1, 1792, %s27_s13, [#allocation6], %s329_s22, %s329_s22, %s330_s23  }
  0x13   :  { %s331_s26 = smov [#allocation2]   ;;  %s332_s28 = smov [#allocation7]  }
  0x14   :  { %s17_s27 = sshll.u32 %s331_s26, 4  ;;  %s39_s29 = sshll.u32 %s332_s28, 4  ;;  %s18_s27 = int_to_ptr.vmem [resolvable:$true] %s17_s27  ;;  %s40_s29 = int_to_ptr.vmem [resolvable:$true] %s39_s29 }
  0x15   :  { %s256_s5 = scalar_lea.hbm %s409_s0, 128 }
  0x16   :  { %p257_p8 = scmp.ne.s32.totalorder %s409_s0, %s256_s5  ;;  %p260_p9 = scmp.lt.u32.totalorder %s256_s5, %s409_s0 }
  0x18   :  { %p262_p10 = pnand %p260_p9, %p257_p8 }
  0x1a   :  { %265 = shalt.err (!%p262_p10)
}
  0x1b   :  { %s266_s1 = scalar_lea.vmem %s18_s27, 128  ;;  %p271_p12 = scmp.lt.s32.totalorder %s18_s27, %s18_s27 }
  0x1c   :  { %p267_p11 = scmp.ne.s32.totalorder %s18_s27, %s266_s1  ;;  %p272_p13 = scmp.lt.s32.totalorder %s266_s1, %s266_s1 }
  0x1e   :  { %p273_p0 = por %p272_p13, %p271_p12 }
  0x20   :  { %p274_p1 = pnand %p273_p0, %p267_p11 }
  0x22   :  { %277 = shalt.err (!%p274_p1)
}
  0x23   :  { %20 = dma.hbm_to_vmem [thread:$0]  %s409_s0, 128, %s18_s27, [#allocation3]  }
  0x24   :  { %s278_s14 = scalar_lea.hbm %s411_s2, 128 }
  0x25   :  { %p279_p2 = scmp.ne.s32.totalorder %s411_s2, %s278_s14  ;;  %p282_p3 = scmp.lt.u32.totalorder %s278_s14, %s411_s2 }
  0x27   :  { %p284_p4 = pnand %p282_p3, %p279_p2 }
  0x29   :  { %287 = shalt.err (!%p284_p4)
}
  0x2a   :  { %s288_s19 = scalar_lea.vmem %s40_s29, 128  ;;  %p293_p6 = scmp.lt.s32.totalorder %s40_s29, %s40_s29 }
  0x2b   :  { %p289_p5 = scmp.ne.s32.totalorder %s40_s29, %s288_s19  ;;  %p294_p7 = scmp.lt.s32.totalorder %s288_s19, %s288_s19 }
  0x2d   :  { %p295_p8 = por %p294_p7, %p293_p6 }
  0x2f   :  { %p296_p9 = pnand %p295_p8, %p289_p5 }
  0x31   :  { %299 = shalt.err (!%p296_p9)
}
  0x32   :  { %42 = dma.hbm_to_vmem [thread:$0]  %s411_s2, 128, %s40_s29, [#allocation6]  }
  0x33   :  { %322 = dma.done.wait [#allocation3], 128  }
  0x34   :  { %323 = vsyncadd [#allocation3], 4294967168 }
  0x35   :  { %324 = dma.done.wait [#allocation6], 1920  }
  0x36   :  { %325 = vsyncadd [#allocation6], 4294965376  ;;  %v333_v0 = vmov 0.0   ;;  %v54_v1 = vld [vmem:[#allocation5 + $0x8] sm:$0xff]  ;;  %v56_v2 = vld [vmem:[#allocation5 + $0x18] sm:$0xff]  ;;  %s334_s2 = smov 32  }
  0x37   :  { %135 = vmatprep.mubr.f32.mxu0 %v333_v0  ;;  %v53_v3 = vld [vmem:[#allocation5] sm:$0xff]  ;;  %v204_v4 = vpack.c.bf16 %v56_v2, %v54_v1  ;;  %v55_v5 = vld [vmem:[#allocation5 + $0x10] sm:$0xff]  ;;  %v58_v6 = vld [vmem:[#allocation5 + $0x28] sm:$0xff]  ;;  %vm67_vm0 = vcmask 457728   ;;  %s335_s21 = smov 64   ;;  %s336_s22 = smov 96  }
  0x38   :  { %v60_v7 = vld [vmem:[#allocation5 + $0x38] sm:$0xff]  ;;  %v206_v8 = vpack.c.bf16 %v55_v5, %v53_v3  ;;  %v57_v10 = vld [vmem:[#allocation5 + $0x20] sm:$0xff]  ;;  %v59_v11 = vld [vmem:[#allocation5 + $0x30] sm:$0xff]  ;;  %vm179_vm1 = vcmask 261120   ;;  %vm181_vm2 = vcmask 523264   ;;  %s337_s23 = smov [#allocation8]  }
  0x39   :  { %v208_v9 = vpack.c.bf16 %v60_v7, %v58_v6  ;;  %v62_v12 = vld [vmem:[#allocation5 + $0x48] sm:$0xff]  ;;  %205 = vmatprep.subr.bf16.mxu0 %v204_v4  ;;  %v64_v13 = vld [vmem:[#allocation5 + $0x58] sm:$0xff]  ;;  %v210_v14 = vpack.c.bf16 %v59_v11, %v57_v10  ;;  %v61_v16 = vld [vmem:[#allocation5 + $0x40] sm:$0xff]  ;;  %s192_s24 = sshll.u32 %s337_s23, 4  ;;  %vm183_vm3 = vcmask 785408   ;;  %s193_s24 = int_to_ptr.vmem [resolvable:$true] %s192_s24 }
  0x3a   :  { %207 = vmatpush1.bf16.msra.mxu0 %v206_v8  ;;  %v212_v15 = vpack.c.bf16 %v64_v13, %v62_v12  ;;  %v63_v17 = vld [vmem:[#allocation5 + $0x50] sm:$0xff]  ;;  %v66_v20 = vld [vmem:[#allocation5 + $0x68] sm:$0xff]  ;;  %v65_v21 = vld [vmem:[#allocation5 + $0x60] sm:$0xff]  ;;  %s300_s25 = scalar_lea.vmem %s193_s24, 128  ;;  %p305_p11 = scmp.lt.s32.totalorder %s193_s24, %s193_s24 }
  0x3b   :  { %209 = vmatprep.subr.bf16.mxu0 %v208_v9  ;;  %v142_v18 = vld [vmem:[#allocation7] sm:$0xff]  ;;  %v214_v19 = vpack.c.bf16 %v63_v17, %v61_v16  ;;  %v52_v22 = vld [vmem:[#allocation2] sm:$0xff]  ;;  %p301_p10 = scmp.ne.s32.totalorder %s193_s24, %s300_s25  ;;  %p306_p12 = scmp.lt.s32.totalorder %s300_s25, %s300_s25 }
  0x3c   :  { %151 = vrot.lane.b32.xlu0 %v142_v18, %s334_s2 }
  0x3d   :  { %p307_p13 = por %p306_p12, %p305_p11 }
  0x3e   :  { %211 = vmatpush1.bf16.msra.mxu0 %v210_v14 }
  0x3f   :  { %213 = vmatprep.subr.bf16.mxu0 %v212_v15  ;;  %p308_p0 = pnand %p307_p13, %p301_p10 }
  0x42   :  { %215 = vmatpush1.bf16.msra.mxu0 %v214_v19 }
  0x43   :  { %83 = vmatprep.subr.mxu0 %v66_v20 }
  0x46   :  { %84 = vmatpush1.msra.mxu0 %v65_v21 }
  0x47   :  { %202 = vmatmul.mubr.msk.f32.vlgmr.msra.gmra.mrb[0].mxu0 %vm67_vm0, %v52_v22 }
  0xae   :  { %v152_v31 = vpop.permute.xlu0 %151 }
 0x11a   :  { %v137_v23 = vpop.f32.mrb[0].mxu0 }
 0x11b   :  { %v203_v24 = vmul.f32 -1.442695, %v137_v23  ;;  %v139_v25 = vpop.f32.mrb[1].mxu0 }
 0x11d   :  { %226 = vpow2.f32 %v203_v24 }
 0x11e   :  { %228 = vtanh.f32 %v139_v25 }
 0x127   :  { %v227_v26 = vpop.eup %226 }
 0x128   :  { %v146_v27 = vadd.f32 1.0, %v227_v26  ;;  %v229_v28 = vpop.eup %228 }
 0x12a   :  { %230 = vrcp.f32 %v146_v27 }
 0x134   :  { %v231_v29 = vpop.eup %230 }
 0x135   :  { %v155_v30 = vmul.f32 %v231_v29, %v229_v28  ;;  %v154_v32 = vmul.f32 %v231_v29, %v152_v31 }
 0x137   :  { %157 = vrot.lane.b32.xlu0 %v155_v30, %s334_s2 }
 0x1a9   :  { %v158_v33 = vpop.permute.xlu0 %157 }
 0x1aa   :  { %v160_v34 = vadd.f32 %v158_v33, %v154_v32 }
 0x1ac   :  { %232 = vtanh.f32 %v160_v34 }
 0x1b6   :  { %v233_v35 = vpop.eup %232 }
 0x1b7   :  { %163 = vrot.lane.b32.xlu1 %v233_v35, %s334_s2 }
 0x1bb   :  { %167 = vrot.lane.b32.xlu1 %v233_v35, %s335_s21 }
 0x229   :  { %v164_v36 = vpop.permute.xlu1 %163 }
 0x22a   :  { %v166_v37 = vmul.f32 %v231_v29, %v164_v36 }
 0x22c   :  { %172 = vrot.lane.b32.xlu0 %v166_v37, %s335_s21 }
 0x22d   :  { %v168_v38 = vpop.permute.xlu1 %167 }
 0x22e   :  { %v170_v39 = vmul.f32 %v231_v29, %v168_v38 }
 0x230   :  { %176 = vrot.lane.b32.xlu1 %v170_v39, %s336_s22 }
 0x29e   :  { %v173_v40 = vpop.permute.xlu0 %172 }
 0x29f   :  { %v180_v41 = vsel %vm179_vm1, %v173_v40, %v160_v34 }
 0x2a2   :  { %v177_v42 = vpop.permute.xlu1 %176 }
 0x2a3   :  { %v182_v43 = vsel %vm181_vm2, %v180_v41, %v177_v42 }
 0x2a4   :  { %v184_v44 = vsel %vm183_vm3, %v182_v43, 0.0 }
 0x2a5   :  { %185 = vst [vmem:[#allocation8] sm:$0xff] %v184_v44 }
 0x2a6   :  { %311 = shalt.err (!%p308_p0)
}
 0x2a7   :  { %s312_s28 = scalar_lea.hbm %s412_s3, 128 }
 0x2a8   :  { %p313_p1 = scmp.ne.s32.totalorder %s412_s3, %s312_s28  ;;  %p316_p2 = scmp.lt.u32.totalorder %s312_s28, %s412_s3 }
 0x2aa   :  { %p318_p3 = pnand %p316_p2, %p313_p1 }
 0x2ac   :  { %321 = shalt.err (!%p318_p3)
}
 0x2ad   :  { %195 = dma.vmem_to_hbm [thread:$0]  %s193_s24, 128, %s412_s3, [#allocation4]  }
 0x2ae   :  { %326 = dma.done.wait [#allocation4], 128  }
 0x2af   :  { %327 = vsyncadd [#allocation4], 4294967168 }
 0x2b0   :  { %199 = vsyncpa [#allocation3], 1 }
 0x2b1   :  { %200 = vsyncpa [#allocation6], 1 }
 0x2b2   :  { %201 = vsyncpa [#allocation4], 1 }

</bundles_post_ra>
